<compile_context>
chip_gen: v5e
topology: v5e:2x2
jax: 0.10.0
libtpu: 0.0.40
codegen_flags: <defaults>
</compile_context>

<pallas_src>
import math

import jax
import jax.numpy as jnp
from jax.experimental import pallas as pl
from jax.experimental.pallas import tpu as pltpu


def _round_up(x, m):
    return ((x + m - 1) // m) * m


def _cdiv(a, b):
    return (a + b - 1) // b


def _time_embed_kernel(t_ref, fp_ref, wt_ref, o_ref):
    # t_ref:  (TB, 1)   f32 timesteps for this batch tile
    # fp_ref: (2, Dk)   f32: row 0 = interleaved frequencies (0 on pad lanes & bias lane),
    #                        row 1 = phase (pi/2 on odd/cos lanes and on the bias lane)
    # wt_ref: (Dk, Dn)  bf16 W^T, zero-padded, with the bias folded into row D
    # o_ref:  (TB, Dn)  output
    fp = fp_ref[...]
    vals = t_ref[...] * fp[0:1, :] + fp[1:2, :]            # (TB, Dk) broadcast
    emb = jnp.sin(vals)                                    # one EUP op does sin AND cos; lane D == 1.0
    y = jnp.dot(emb.astype(jnp.bfloat16), wt_ref[...],
                preferred_element_type=jnp.float32)        # bf16 MXU, f32 accumulate (bias via lane D)
    o_ref[...] = jnp.maximum(y, 0.0).astype(o_ref.dtype)   # ReLU


def make_time_embedding_params(frequencies_half, weight, bias, lane_pad=128):
    """One-time preprocessing (do this at model init, NOT per diffusion step)."""
    D = weight.shape[0]
    Dk = _round_up(D + 1, lane_pad)   # K dim: +1 spare lane carries the folded bias
    Dn = _round_up(D, lane_pad)       # N dim / output lanes

    # Merged freq/phase constant.
    fp = jnp.zeros((2, Dk), jnp.float32)
    fp = fp.at[0, :D].set(jnp.repeat(frequencies_half.astype(jnp.float32), 2))  # f0,f0,f1,f1,...
    fp = fp.at[1, 1:D:2].set(jnp.pi / 2)   # odd lanes -> cos(x) == sin(x + pi/2)
    fp = fp.at[1, D].set(jnp.pi / 2)       # bias lane: freq 0, phase pi/2 -> emb lane D == 1.0

    # W^T zero-padded to (Dk, Dn) with the bias written into row D (multiplied by the 1.0 lane).
    wt = jnp.zeros((Dk, Dn), jnp.bfloat16)
    wt = wt.at[:D, :D].set(weight.astype(jnp.float32).T.astype(jnp.bfloat16))
    wt = wt.at[D, :D].set(bias.astype(jnp.float32).astype(jnp.bfloat16))

    return {"fp": fp, "wt": wt, "D": D, "Dk": Dk, "Dn": Dn}


def _choose_tiling(B):
    """Batch tiling: 1 step for small B; otherwise an even number of <=256-row steps."""
    Bp = _round_up(B, 8)
    if Bp <= 256:
        return Bp, Bp, 1                    # single grid step: no per-step overhead
    n = _cdiv(Bp, 256)
    if n % 2:                               # even step count -> both v7x TensorCores busy
        n += 1
    TB = _round_up(_cdiv(Bp, n), 8)
    return TB, TB * n, n


def time_embedding_block(timestep, params, *, out_dtype=jnp.float32, return_padded=False):
    """timestep: (B,) float; params from make_time_embedding_params.

    Returns (B, D) by default (module semantics). With return_padded=True returns the raw
    (Bp, Dn) kernel output slab; rows >= B and cols >= D are padding and must be ignored.
    """
    B = timestep.shape[0]
    D, Dk, Dn = params["D"], params["Dk"], params["Dn"]
    TB, Bp, n_blocks = _choose_tiling(B)

    t2d = timestep.astype(jnp.float32).reshape(B, 1)
    if Bp != B:                              # only pay the pad pass when actually needed
        t2d = jnp.zeros((Bp, 1), jnp.float32).at[:B, :].set(t2d)

    out = pl.pallas_call(
        _time_embed_kernel,
        out_shape=jax.ShapeDtypeStruct((Bp, Dn), out_dtype),
        grid_spec=pltpu.PrefetchScalarGridSpec(
            num_scalar_prefetch=0,
            grid=(n_blocks,),
            in_specs=[
                pl.BlockSpec((TB, 1), lambda i: (i, 0)),     # streamed per batch tile
                pl.BlockSpec((2, Dk), lambda i: (0, 0)),     # resident freq/phase constant
                pl.BlockSpec((Dk, Dn), lambda i: (0, 0)),    # resident W^T (+ folded bias), bf16
            ],
            out_specs=pl.BlockSpec((TB, Dn), lambda i: (i, 0)),
        ),
        compiler_params=pltpu.CompilerParams(
            dimension_semantics=("parallel",)),              # batch rows split across TCs on v7x
    )(t2d, params["fp"], params["wt"])

    if return_padded:
        return out
    if Bp != B or Dn != D:
        out = out[:B, :D]                    # separate XLA slice; skipped when no padding happened
    return out


def _reference(timestep, frequencies_half, weight, bias):
    B = timestep.shape[0]
    D = weight.shape[0]
    vals = frequencies_half[None, :] * timestep[:, None]          # (B, D//2)
    emb = jnp.zeros((B, D), jnp.float32)
    emb = emb.at[:, 0::2].set(jnp.sin(vals))
    emb = emb.at[:, 1::2].set(jnp.cos(vals))
    y = emb @ weight.T + bias
    return jnp.maximum(y, 0.0)


if __name__ == "__main__":
    B = 8
    D = 32  # time_embedding_dim

    key = jax.random.PRNGKey(0)
    k_t, k_w, k_b = jax.random.split(key, 3)

    # deterministic "parameters" (shapes from nn.Linear(D, D))
    weight = jax.random.normal(k_w, (D, D), jnp.float32) * 0.1
    bias = jax.random.normal(k_b, (D,), jnp.float32) * 0.1

    # frequencies as in __init__: exp(-2*(arange(D//2)+1)/D * ln(10000))
    frequencies_half = jnp.exp(
        -2.0 * (jnp.arange(D // 2, dtype=jnp.float32) + 1.0) / D * math.log(10000.0)
    )

    # timesteps (e.g. diffusion steps) as float
    timestep = jax.random.randint(k_t, (B,), 0, 1000).astype(jnp.float32)

    # one-time preprocessing (hoisted out of the per-step path)
    params = make_time_embedding_params(frequencies_half, weight, bias)

    out = jax.block_until_ready(time_embedding_block(timestep, params))

    ref = _reference(timestep, frequencies_half, weight, bias)
    assert out.shape == (B, D)
    # bf16 MXU operands (weights + folded bias) -> looser tolerance than a pure-f32 path.
    assert jnp.allclose(out, ref, atol=5e-2, rtol=5e-2), "mismatch vs reference"

    print("KERNEL_OK")
</pallas_src>

<mosaic_0001>
module attributes {stable_mosaic.version = 11 : i64} {
  func.func @_time_embed_kernel(%arg0: i32, %arg1: memref<8x1xf32, #tpu.memory_space<vmem>>, %arg2: memref<2x128xf32, #tpu.memory_space<vmem>>, %arg3: memref<128x128xbf16, #tpu.memory_space<vmem>>, %arg4: memref<8x128xf32, #tpu.memory_space<vmem>>) attributes {dimension_semantics = [#tpu.dimension_semantics<parallel>], iteration_bounds = array<i64: 1>, scalar_prefetch = 0 : i64, scratch_operands = 0 : i64, tpu.core_type = #tpu.core_type<tc>, window_params = [{transform_indices = @transform_0, window_bounds = array<i64: 8, 1>}, {pipeline_mode = #tpu.pipeline_mode<synchronous>, transform_indices = @transform_1, window_bounds = array<i64: 2, 128>}, {pipeline_mode = #tpu.pipeline_mode<synchronous>, transform_indices = @transform_2, window_bounds = array<i64: 128, 128>}, {transform_indices = @transform_3, window_bounds = array<i64: 8, 128>}]} {
    %c0 = arith.constant 0 : index
    %c0_0 = arith.constant 0 : index
    %0 = vector.load %arg2[%c0, %c0_0] : memref<2x128xf32, #tpu.memory_space<vmem>>, vector<2x128xf32>
    %c0_1 = arith.constant 0 : index
    %c0_2 = arith.constant 0 : index
    %1 = vector.load %arg1[%c0_1, %c0_2] : memref<8x1xf32, #tpu.memory_space<vmem>>, vector<8x1xf32>
    %2 = vector.extract_strided_slice %0 {offsets = [0, 0], sizes = [1, 128], strides = [1, 1]} : vector<2x128xf32> to vector<1x128xf32>
    %3 = vector.broadcast %1 : vector<8x1xf32> to vector<8x128xf32>
    %4 = vector.broadcast %2 : vector<1x128xf32> to vector<8x128xf32>
    %5 = arith.mulf %3, %4 : vector<8x128xf32>
    %6 = vector.extract_strided_slice %0 {offsets = [1, 0], sizes = [1, 128], strides = [1, 1]} : vector<2x128xf32> to vector<1x128xf32>
    %7 = vector.broadcast %6 : vector<1x128xf32> to vector<8x128xf32>
    %8 = arith.addf %5, %7 : vector<8x128xf32>
    %9 = math.sin %8 : vector<8x128xf32>
    %10 = arith.truncf %9 : vector<8x128xf32> to vector<8x128xbf16>
    %c0_3 = arith.constant 0 : index
    %c0_4 = arith.constant 0 : index
    %11 = vector.load %arg3[%c0_3, %c0_4] : memref<128x128xbf16, #tpu.memory_space<vmem>>, vector<128x128xbf16>
    %cst = arith.constant dense<0.000000e+00> : vector<8x128xf32>
    %12 = tpu.matmul %10, %11, %cst {dimension_numbers = #tpu.dot_dimension_numbers<[1], [0], [0], [1], [0, 0, 1, 1], [], []>} : vector<8x128xbf16>, vector<128x128xbf16>, vector<8x128xf32> -> vector<8x128xf32>
    %cst_5 = arith.constant 0.000000e+00 : f32
    %13 = vector.broadcast %cst_5 : f32 to vector<8x128xf32>
    %14 = arith.maximumf %12, %13 : vector<8x128xf32>
    %c0_6 = arith.constant 0 : index
    %c0_7 = arith.constant 0 : index
    %15 = vector.load %arg4[%c0_6, %c0_7] : memref<8x128xf32, #tpu.memory_space<vmem>>, vector<8x128xf32>
    tpu.vector_store %arg4[%c0_6, %c0_7], %14 {strides = array<i32>} : memref<8x128xf32, #tpu.memory_space<vmem>>, vector<8x128xf32>,
    return
  }
  func.func @transform_0(%arg0: i32) -> (i32, i32) {
    %c0_i32 = arith.constant 0 : i32
    %c0_i32_0 = arith.constant 0 : i32
    return %arg0, %c0_i32 : i32, i32
  }
  func.func @transform_1(%arg0: i32) -> (i32, i32) {
    %c0_i32 = arith.constant 0 : i32
    %c0_i32_0 = arith.constant 0 : i32
    %c0_i32_1 = arith.constant 0 : i32
    return %c0_i32, %c0_i32_0 : i32, i32
  }
  func.func @transform_2(%arg0: i32) -> (i32, i32) {
    %c0_i32 = arith.constant 0 : i32
    %c0_i32_0 = arith.constant 0 : i32
    %c0_i32_1 = arith.constant 0 : i32
    return %c0_i32, %c0_i32_0 : i32, i32
  }
  func.func @transform_3(%arg0: i32) -> (i32, i32) {
    %c0_i32 = arith.constant 0 : i32
    %c0_i32_0 = arith.constant 0 : i32
    return %arg0, %c0_i32 : i32, i32
  }
}

</mosaic_0001>

<bundles_post_ra>
// kernel: tpu_custom_call.1
= control target key start
LH: loop header
LB: loop body
LE: loop exit
PB: predicated region body
PF: predicated region fallthrough
CT: control target
= control target key end

     0   :  { %8 = vsyncpa [#allocation3], 0  ;;  %s503_s0 = inlined_call_operand.vmem [shape: f32[8,1], index: 0, kind: input, shape index: {}]   ;;  %s504_s1 = inlined_call_operand.vmem [shape: f32[2,128], index: 1, kind: input, shape index: {}]   ;;  %s505_s2 = inlined_call_operand.hbm [shape: bf16[128,128], index: 2, kind: input, shape index: {}]   ;;  %s506_s3 = inlined_call_operand.hbm [shape: f32[8,128], index: 3, kind: output, shape index: {}]  }
   0x1   :  { %9 = vsyncpa [#allocation4], 0  ;;  %s18_s14 = sshll.u32 %s505_s2, 4  ;;  %s401_s15 = smov [#allocation2]   ;;  %s19_s14 = int_to_ptr.hbm [resolvable:$true] %s18_s14 }
   0x2   :  { %s20_s16 = sshll.u32 %s401_s15, 4  ;;  %s402_s17 = smov 64   ;;  %s21_s16 = int_to_ptr.vmem [resolvable:$true] %s20_s16 }
   0x3   :  { %s403_s18 = smov 4  }
   0x4   :  { %26 = dma.hbm_to_vmem [thread:$0]  %s19_s14, 1024, %s21_s16, [#allocation3], %s402_s17, %s402_s17, %s403_s18  }
   0x5   :  { %397 = dma.done.wait [#allocation3], 1024  }
   0x6   :  { %398 = vsyncadd [#allocation3], 4294966272  ;;  %v404_v0 = vmov 0   ;;  %v32_v1 = vld [vmem:[%s503_s0] sm:$0xff]  ;;  %v336_v2 = vld [vmem:[#allocation2 + $0x38] sm:$0xff]  ;;  %s411_s0 = smov [#allocation5]  }
   0x7   :  { %348 = vset.pattern.permute.xlu0 %v404_v0  ;;  %262 = vmatpush.bf16.msra.mxu0 %v336_v2  ;;  %v335_v3 = vld [vmem:[#allocation2 + $0x30] sm:$0xff]  ;;  %v31_v4 = vld [vmem:[%s504_s1] sm:$0x3]  ;;  %v334_v6 = vld [vmem:[#allocation2 + $0x28] sm:$0xff]  ;;  %v405_v27 = vmov 2102212464  }
   0x8   :  { %35 = vperm.xlu0 %348, %v32_v1   ;;  %v38_v5 = vperm.slane %v31_v4, 0  ;;  %v40_v7 = vperm.slane %v31_v4, 1  ;;  %v333_v10 = vld [vmem:[#allocation2 + $0x20] sm:$0xff]  ;;  %v332_v13 = vld [vmem:[#allocation2 + $0x18] sm:$0xff]  ;;  %v331_v16 = vld [vmem:[#allocation2 + $0x10] sm:$0xff]  ;;  %s282_s1 = sshll.u32 %s411_s0, 4  ;;  %s283_s1 = int_to_ptr.vmem [resolvable:$true] %s282_s1 }
   0x9   :  { %v330_v19 = vld [vmem:[#allocation2 + $0x8] sm:$0xff]  ;;  %v329_v24 = vld [vmem:[#allocation2] sm:$0xff]  ;;  %v406_v29 = vmov 920167782   ;;  %v407_v32 = vmov 1326507024  }
   0xa   :  { %v408_v34 = vmov 683565275   ;;  %v409_v36 = vmov 2475754826   ;;  %v410_v39 = vmov 2131351028  }
   0xb   :  { %263 = vmatpush.bf16.msra.mxu0 %v335_v3  ;;  %s284_s24 = sshll.u32 %s506_s3, 4  ;;  %s285_s24 = int_to_ptr.hbm [resolvable:$true] %s284_s24 }
   0xf   :  { %264 = vmatpush.bf16.msra.mxu0 %v334_v6 }
  0x13   :  { %265 = vmatpush.bf16.msra.mxu0 %v333_v10 }
  0x17   :  { %266 = vmatpush.bf16.msra.mxu0 %v332_v13 }
  0x1b   :  { %267 = vmatpush.bf16.msra.mxu0 %v331_v16 }
  0x1f   :  { %268 = vmatpush.bf16.msra.mxu0 %v330_v19 }
  0x23   :  { %269 = vmatpush.bf16.msra.mxu0 %v329_v24 }
  0x7a   :  { %v36_v8 = vpop.permute.xlu0 %35 }
  0x7b   :  { %v39_v9 = vmul.f32 %v38_v5, %v36_v8 }
  0x7d   :  { %v442_v11 = vadd.f32 %v40_v7, %v39_v9 }
  0x7f   :  { %v45_v12 = vand.u32 2139095040, %v442_v11  ;;  %v42_v17 = vand.u32 2147483647, %v442_v11  ;;  %vm44_vm12 = vcmp.lt.s32.totalorder %v442_v11, 0 }
  0x81   :  { %v46_v14 = vshrl.u32 %v45_v12, 23  ;;  %v49_v20 = vand.u32 8388607, %v42_v17  ;;  %vm43_vm13 = vcmp.le.f32.partialorder %v42_v17, 0.7853982 }
  0x83   :  { %v294_v15 = vadd.s32 4294967169, %v46_v14  ;;  %v50_v25 = vor.u32 8388608, %v49_v20 }
  0x85   :  { %v52_v18 = vadd.s32 1, %v294_v15  ;;  %v457_v46 = vshll.u32 %v50_v25, 8 }
  0x87   :  { %vm53_vm0 = vcmp.gt.s32.totalorder %v52_v18, 0  ;;  %v91_v56 = vand.u32 65535, %v457_v46  ;;  %v92_v58 = vshrl.u32 %v457_v46, 16 }
  0x88   :  { %v54_v21 = vsel %vm53_vm0, %v52_v18, 0 }
  0x89   :  { %v56_v22 = vand.u32 31, %v54_v21  ;;  %v450_v26 = vshrl.u32 %v54_v21, 5 }
  0x8b   :  { %v448_v23 = vsub.s32 32, %v56_v22  ;;  %v68_v28 = vshll.u32 %v405_v27, %v56_v22  ;;  %v71_v30 = vshll.u32 %v406_v29, %v56_v22  ;;  %v59_v35 = vshll.u32 %v408_v34, %v56_v22 }
  0x8c   :  { %v62_v38 = vshll.u32 %v409_v36, %v56_v22  ;;  %v65_v41 = vshll.u32 %v410_v39, %v56_v22  ;;  %vm77_vm1 = vcmp.lt.s32.totalorder %v450_v26, 4  ;;  %vm74_vm2 = vcmp.lt.s32.totalorder %v450_v26, 1 }
  0x8d   :  { %v69_v31 = vshrl.u32 %v406_v29, %v448_v23  ;;  %v72_v33 = vshrl.u32 %v407_v32, %v448_v23  ;;  %v60_v37 = vshrl.u32 %v409_v36, %v448_v23  ;;  %v63_v40 = vshrl.u32 %v410_v39, %v448_v23 }
  0x8e   :  { %v66_v42 = vshrl.u32 %v405_v27, %v448_v23  ;;  %vm76_vm3 = vcmp.lt.s32.totalorder %v450_v26, 3  ;;  %vm75_vm4 = vcmp.lt.s32.totalorder %v450_v26, 2  ;;  %v58_v20 = vshrl.u32 %v408_v34, %v448_v23 }
  0x8f   :  { %v70_v43 = vor.u32 %v69_v31, %v68_v28  ;;  %v73_v44 = vor.u32 %v72_v33, %v71_v30  ;;  %v61_v45 = vor.u32 %v60_v37, %v59_v35  ;;  %v64_v47 = vor.u32 %v63_v40, %v62_v38 }
  0x90   :  { %v67_v48 = vor.u32 %v66_v42, %v65_v41 }
  0x91   :  { %v83_v49 = vsel %vm77_vm1, %v70_v43, 920167782  ;;  %v87_v50 = vsel %vm77_vm1, %v73_v44, 1326507024  ;;  %v82_v51 = vsel %vm74_vm2, %v61_v45, %v64_v47  ;;  %v78_v28 = vsel %vm74_vm2, %v58_v20, %v61_v45 }
  0x92   :  { %v84_v52 = vsel %vm76_vm3, %v67_v48, %v83_v49  ;;  %v86_v53 = vsel %vm74_vm2, %v64_v47, %v67_v48  ;;  %v88_v55 = vsel %vm76_vm3, %v70_v43, %v87_v50  ;;  %v79_v16 = vsel %vm77_vm1, %v67_v48, 2102212464 }
  0x93   :  { %v85_v54 = vsel %vm75_vm4, %v82_v51, %v84_v52  ;;  %v89_v57 = vsel %vm75_vm4, %v86_v53, %v88_v55  ;;  %v80_v29 = vsel %vm76_vm3, %v64_v47, %v79_v16  ;;  %vm185_vm1 = vweird.f32 %v442_v11 }
  0x94   :  { %v115_v59 = vand.u32 65535, %v85_v54  ;;  %v116_v60 = vshrl.u32 %v85_v54, 16  ;;  %v93_v61 = vand.u32 65535, %v89_v57  ;;  %v94_v62 = vshrl.u32 %v89_v57, 16 }
  0x95   :  { %v81_v34 = vsel %vm75_vm4, %v78_v28, %v80_v29 }
  0x96   :  { %v118_v63 = vmul.u32 %v116_v60, %v91_v56  ;;  %v119_v1 = vmul.u32 %v115_v59, %v92_v58  ;;  %v96_v2 = vmul.u32 %v94_v62, %v91_v56  ;;  %v97_v3 = vmul.u32 %v93_v61, %v92_v58 }
  0x97   :  { %v117_v4 = vmul.u32 %v115_v59, %v91_v56  ;;  %v95_v6 = vmul.u32 %v93_v61, %v91_v56  ;;  %v120_v8 = vmul.u32 %v116_v60, %v92_v58  ;;  %v98_v9 = vmul.u32 %v94_v62, %v92_v58 }
  0x98   :  { %v121_v5 = vshll.u32 %v118_v63, 16  ;;  %v99_v7 = vshll.u32 %v96_v2, 16  ;;  %v123_v10 = vshll.u32 %v119_v1, 16  ;;  %v101_v13 = vshll.u32 %v97_v3, 16 }
  0x99   :  { %v122_v25 = vshrl.u32 %v118_v63, 16  ;;  %v100_v30 = vshrl.u32 %v96_v2, 16  ;;  %v124_v32 = vshrl.u32 %v119_v1, 16  ;;  %v102_v35 = vshrl.u32 %v97_v3, 16 }
  0x9a   :  { %vm125_vm5 = vc.u32 %v117_v4, %v121_v5  ;;  %v127_v12 = vadd.s32 %v121_v5, %v117_v4  ;;  %vm103_vm6 = vc.u32 %v95_v6, %v99_v7  ;;  %v105_v14 = vadd.s32 %v99_v7, %v95_v6 }
  0x9b   :  { %v126_v15 = vsel %vm125_vm5, 1, %v404_v0  ;;  %v104_v18 = vsel %vm103_vm6, 1, %v404_v0  ;;  %v135_v39 = vmul.u32 %v457_v46, %v81_v34 }
  0x9c   :  { %v128_v19 = vadd.s32 %v126_v15, %v120_v8  ;;  %vm129_vm7 = vc.u32 %v127_v12, %v123_v10  ;;  %v106_v21 = vadd.s32 %v104_v18, %v98_v9  ;;  %vm107_vm8 = vc.u32 %v105_v14, %v101_v13 }
  0x9d   :  { %v130_v22 = vsel %vm129_vm7, 1, %v404_v0  ;;  %v108_v24 = vsel %vm107_vm8, 1, %v404_v0  ;;  %v131_v0 = vadd.s32 %v127_v12, %v123_v10 }
  0x9e   :  { %v132_v27 = vadd.s32 %v130_v22, %v128_v19  ;;  %v110_v31 = vadd.s32 %v108_v24, %v106_v21 }
  0xa0   :  { %v133_v33 = vadd.s32 %v132_v27, %v122_v25  ;;  %v111_v23 = vadd.s32 %v110_v31, %v100_v30 }
  0xa2   :  { %v134_v36 = vadd.s32 %v133_v33, %v124_v32  ;;  %v112_v37 = vadd.s32 %v111_v23, %v102_v35 }
  0xa4   :  { %v138_v38 = vadd.s32 1, %v134_v36  ;;  %vm137_vm9 = vc.u32 %v112_v37, %v131_v0  ;;  %v136_v51 = vadd.s32 %v131_v0, %v112_v37 }
  0xa6   :  { %v139_v40 = vsel %vm137_vm9, %v138_v38, %v134_v36 }
  0xa7   :  { %v140_v41 = vadd.s32 %v139_v40, %v135_v39 }
  0xa9   :  { %v141_v42 = vadd.s32 536870912, %v140_v41 }
  0xab   :  { %v142_v43 = vshrl.u32 %v141_v42, 30 }
  0xad   :  { %v143_v44 = vshll.u32 %v142_v43, 30  ;;  %v166_v1 = vsub.s32 4, %v142_v43 }
  0xaf   :  { %v144_v45 = vsub.s32 %v140_v41, %v143_v44  ;;  %v167_v6 = vsel %vm44_vm12, %v166_v1, %v142_v43 }
  0xb0   :  { %v169_v9 = vsel %vm43_vm13, 0, %v167_v6 }
  0xb1   :  { %vm145_vm10 = vcmp.lt.s32.totalorder %v144_v45, 0  ;;  %v146_v47 = vsub.s32 0, %v144_v45  ;;  %v186_v15 = vadd.s32 3, %v169_v9 }
  0xb3   :  { %v147_v48 = vsel %vm145_vm10, %v146_v47, %v144_v45  ;;  %v187_v20 = vand.u32 3, %v186_v15 }
  0xb4   :  { %v148_v49 = vclz %v147_v48 }
  0xb5   :  { %vm189_vm14 = vcmp.eq.s32.totalorder %v187_v20, 0  ;;  %vm192_vm15 = vcmp.eq.s32.totalorder %v187_v20, 2  ;;  %vm188_vm0 = vcmp.lt.s32.totalorder %v187_v20, 2 }
  0xb6   :  { %v295_v50 = vadd.s32 4294967294, %v148_v49 }
  0xb8   :  { %vm296_vm11 = vcmp.lt.s32.totalorder %v295_v50, 0 }
  0xb9   :  { %v151_v26 = vsel %vm296_vm11, 0, %v295_v50 }
  0xba   :  { %v152_v52 = vsub.s32 32, %v151_v26  ;;  %v156_v53 = vsub.s32 4294967266, %v151_v26  ;;  %v153_v54 = vshll.u32 %v144_v45, %v151_v26 }
  0xbc   :  { %v154_v55 = vshrl.u32 %v136_v51, %v152_v52  ;;  %v157_v46 = vadd.s32 127, %v156_v53 }
  0xbe   :  { %v155_v56 = vor.u32 %v154_v55, %v153_v54  ;;  %v158_v57 = vshll.u32 %v157_v46, 23 }
  0xc0   :  { %v159_v58 = vor.u32 4788187, %v158_v57  ;;  %v162_v60 = vcvt.s32.f32 %v155_v56 }
  0xc2   :  { %v160_v59 = vand.u32 2147483647, %v159_v58 }
  0xc4   :  { %v163_v61 = vmul.f32 %v162_v60, %v160_v59 }
  0xc6   :  { %v164_v62 = vxor.u32 2147483648, %v163_v61 }
  0xc8   :  { %v165_v63 = vsel %vm44_vm12, %v164_v62, %v163_v61 }
  0xc9   :  { %v168_v2 = vsel %vm43_vm13, %v442_v11, %v165_v63 }
  0xca   :  { %v170_v3 = vmul.f32 %v168_v2, %v168_v2 }
  0xcc   :  { %v171_v4 = vmul.f32 -0.001358992, %v170_v3  ;;  %v178_v5 = vmul.f32 -0.00019511016, %v170_v3 }
  0xce   :  { %v172_v7 = vadd.f32 0.041655596, %v171_v4  ;;  %v179_v8 = vadd.f32 0.008332121, %v178_v5 }
  0xd0   :  { %v173_v10 = vmul.f32 %v172_v7, %v170_v3  ;;  %v180_v12 = vmul.f32 %v179_v8, %v170_v3 }
  0xd2   :  { %v174_v13 = vadd.f32 -0.4999988, %v173_v10  ;;  %v181_v14 = vadd.f32 -0.16666654, %v180_v12 }
  0xd4   :  { %v175_v16 = vmul.f32 %v174_v13, %v170_v3  ;;  %v182_v18 = vmul.f32 %v181_v14, %v170_v3 }
  0xd6   :  { %v176_v19 = vadd.f32 1.0, %v175_v16  ;;  %v183_v17 = vadd.f32 1.0, %v182_v18 }
  0xd8   :  { %v184_v21 = vmul.f32 %v183_v17, %v168_v2  ;;  %v193_v22 = vxor.u32 2147483648, %v176_v19 }
  0xda   :  { %v190_v24 = vxor.u32 2147483648, %v184_v21  ;;  %v194_v27 = vsel %vm192_vm15, %v193_v22, %v184_v21 }
  0xdc   :  { %v191_v25 = vsel %vm189_vm14, %v176_v19, %v190_v24 }
  0xdd   :  { %v195_v28 = vsel %vm188_vm0, %v191_v25, %v194_v27 }
  0xde   :  { %v196_v29 = vsel %vm185_vm1, nan, %v195_v28 }
  0xdf   :  { %v197_v30 = vpack.c.bf16 %v196_v29, %v196_v29 }
  0xe1   :  { %270 = vmatmul.bf16.vlgmr.msra.gmra.mxu0 %v197_v30 }
 0x15e   :  { %v271_v31 = vpop.f32.mrf.mxu0 }
 0x15f   :  { %v275_v32 = vmax.f32 %v271_v31, 0.0 }
 0x161   :  { %276 = vst [vmem:[#allocation5] sm:$0xff] %v275_v32 }
 0x162   :  { %287 = dma.vmem_to_hbm [thread:$0]  %s283_s1, 128, %s285_s24, [#allocation4]  }
 0x166   :  { %v273_v33 = vpop.f32.mrf.mxu0 }
 0x167   :  { %399 = dma.done.wait [#allocation4], 128  }
 0x168   :  { %400 = vsyncadd [#allocation4], 4294967168 }
 0x169   :  { %292 = vsyncpa [#allocation3], 1 }
 0x16a   :  { %293 = vsyncpa [#allocation4], 1 }

</bundles_post_ra>
